<compile_context>
chip_gen: v6e
topology: v6e:2x2x1
jax: 0.10.0
libtpu: 0.0.40
codegen_flags: <defaults>
</compile_context>

<pallas_src>
import functools

import jax
import jax.numpy as jnp
from jax.experimental import pallas as pl
from jax.experimental.pallas import tpu as pltpu

# ---- Model hyper-parameters (consistent with ValueNetwork.__init__) ----
B = 2            # batch size
N = 8            # number of humans
INPUT_DIM = 13   # length of a rotated state
SELF_DIM = 6     # self_state_dim
MLP1_DIMS = [64, 32]      # mlp1 (last_relu=True) -> global_state_dim = 32
MLP2_DIMS = [32, 32]      # mlp2
ATT_DIMS = [32, 1]        # attention (with_global_state=True -> input 2*32)
MLP3_DIMS = [32, 1]       # mlp3 (input = mlp2[-1] + self_state_dim)
G = MLP1_DIMS[-1]
F = MLP2_DIMS[-1]
A = ATT_DIMS[0]
H3 = MLP3_DIMS[0]

D_PAD = 64        # state feature dim padded to 64 lanes
C = 64            # internal (padded) activation width
OUT_LANES = 128   # packed output width (value + attention weights)

# ws slab slot indices (each a zero-padded 64x64 block)
W1A, W1B, W2B, WATG = range(4)
# v slab row indices (each a zero-padded 128-lane row)
R_B1A, R_B1B, R_B2A_BA1, R_B2B, R_B3A, R_WA2, R_W3B, R_SCAL = range(8)


def _value_net_kernel(state_ref, ws_ref, wf_ref, w3_ref, v_ref, out_ref, *, bt, n):
    f32 = jnp.float32

    x = state_ref[...]                       # (bt, n, D_PAD), lanes >= 13 are zero
    v = v_ref[...]                           # (8, 128)

    x2 = x.reshape(bt * n, D_PAD)            # (bt*n, 64)

    # ---- mlp1: Linear -> ReLU -> Linear -> ReLU (last_relu=True) ----
    h = jnp.maximum(
        jnp.dot(x2, ws_ref[W1A], preferred_element_type=f32) + v[R_B1A:R_B1A + 1, :C],
        0.0)
    h1 = jnp.maximum(
        jnp.dot(h, ws_ref[W1B], preferred_element_type=f32) + v[R_B1B:R_B1B + 1, :C],
        0.0)                                                           # (bt*n, 64)

    # ---- fused (mlp2 layer-1 | attention layer-1) on the shared LHS h1 ----
    fused = (jnp.dot(h1, wf_ref[...], preferred_element_type=f32)
             + v[R_B2A_BA1:R_B2A_BA1 + 1, :])                          # (bt*n, 128)
    h2a = jnp.maximum(fused[:, :C], 0.0)                               # mlp2 hidden
    att_pre = fused[:, C:]                                             # attn pre-act

    # mlp2 layer-2 (no final ReLU)
    h2 = (jnp.dot(h2a, ws_ref[W2B], preferred_element_type=f32)
          + v[R_B2B:R_B2B + 1, :C])                                    # (bt*n, 64)

    # ---- global state = per-batch mean of mlp1 output ----
    h1_3 = h1.reshape(bt, n, C)
    g = jnp.mean(h1_3, axis=1)                                         # (bt, 64)
    gw = jnp.dot(g, ws_ref[WATG], preferred_element_type=f32)          # (bt, 64)

    # attention layer-1: relu(h1 @ Wah + ba1 + global @ Wag)
    a3 = jnp.maximum(att_pre.reshape(bt, n, C) + gw[:, None, :], 0.0)  # (bt, n, 64)

    # attention layer-2 (rank-1) as VPU multiply + lane reduction
    wa2 = v[R_WA2:R_WA2 + 1, :C]
    ba2 = v[R_SCAL:R_SCAL + 1, 0:1]
    scores = jnp.sum(a3 * wa2, axis=-1, keepdims=True) + ba2           # (bt, n, 1)

    # masked softmax (exact-zero mask, as in the PyTorch reference)
    scores_exp = jnp.exp(scores) * (scores != 0.0).astype(f32)
    wts = scores_exp / jnp.sum(scores_exp, axis=1, keepdims=True)      # (bt, n, 1)

    weighted = jnp.sum(wts * h2.reshape(bt, n, C), axis=1)             # (bt, 64)

    # ---- mlp3: joint = [self_state_pad | weighted] lane-concat, single K=128 dot ----
    self_pad = x[:, 0, :]                       # (bt, 64); lanes >= 6 nulled by W3 zeros
    joint = jnp.concatenate([self_pad, weighted], axis=-1)             # (bt, 128)
    j = jnp.maximum(
        jnp.dot(joint, w3_ref[...], preferred_element_type=f32) + v[R_B3A:R_B3A + 1, :C],
        0.0)                                                           # (bt, 64)
    w3b = v[R_W3B:R_W3B + 1, :C]
    b3b = v[R_SCAL:R_SCAL + 1, 1:2]
    val = jnp.sum(j * w3b, axis=-1, keepdims=True) + b3b               # (bt, 1)

    # ---- lane-dense packed output: lane 0 = value, lanes 1..n = attention weights ----
    wts_row = wts.reshape(bt, n)
    pad = jnp.zeros((bt, OUT_LANES - 1 - n), f32)
    out_ref[...] = jnp.concatenate([val, wts_row, pad], axis=-1)


def value_network_forward(state_padded, ws, wf, w3, vs, *, block_b=None):
    """state_padded: (B, N, 64) f32 (zero-padded rotated states).

    Returns (value (B,1), attention_weights (B,N)).
    For large B pass block_b (multiple of 8); params stay VMEM-resident across
    batch tiles and the batch grid axis is megacore-parallel.
    """
    bsz, n, dpad = state_padded.shape
    bt = bsz if block_b is None else block_b
    kernel = functools.partial(_value_net_kernel, bt=bt, n=n)

    packed = pl.pallas_call(
        kernel,
        out_shape=jax.ShapeDtypeStruct((bsz, OUT_LANES), jnp.float32),
        grid=(bsz // bt,),
        in_specs=[
            pl.BlockSpec((bt, n, dpad), lambda i: (i, 0, 0)),       # state: per-tile
            pl.BlockSpec((4, C, C), lambda i: (0, 0, 0)),           # ws: resident
            pl.BlockSpec((C, 2 * C), lambda i: (0, 0)),             # fused W2A|WATH
            pl.BlockSpec((2 * C, C), lambda i: (0, 0)),             # stacked [W3S;W3F]
            pl.BlockSpec((8, OUT_LANES), lambda i: (0, 0)),         # bias/row slab
        ],
        out_specs=pl.BlockSpec((bt, OUT_LANES), lambda i: (i, 0)),
        compiler_params=pltpu.CompilerParams(
            dimension_semantics=("parallel",)),
    )(state_padded, ws, wf, w3, vs)

    value = packed[:, 0:1]
    attn_weights = packed[:, 1:1 + n]
    return value, attn_weights


def pad_state(state):
    """Zero-pad the rotated-state feature dim to 64 lanes (exact zeros)."""
    bsz, n, d = state.shape
    return jnp.pad(state, ((0, 0), (0, 0), (0, D_PAD - d)))


def pack_params(p):
    """Host-side packing of the 18 parameter arrays into 4 lane-padded slabs."""
    ws = jnp.zeros((4, C, C), jnp.float32)
    ws = ws.at[W1A, :INPUT_DIM, :MLP1_DIMS[0]].set(p["w1a"])
    ws = ws.at[W1B, :MLP1_DIMS[0], :G].set(p["w1b"])
    ws = ws.at[W2B, :MLP2_DIMS[0], :F].set(p["w2b"])
    ws = ws.at[WATG, :G, :A].set(p["wag"])

    # fused (64,128): lanes 0:64 = W_MLP2A, lanes 64:128 = W_ATT_H
    wf = jnp.zeros((C, 2 * C), jnp.float32)
    wf = wf.at[:G, 0:MLP2_DIMS[0]].set(p["w2a"])
    wf = wf.at[:G, C:C + A].set(p["wah"])

    # stacked (128,64): rows 0:64 = W3S (self_state), rows 64:128 = W3F (weighted)
    w3 = jnp.zeros((2 * C, C), jnp.float32)
    w3 = w3.at[:SELF_DIM, :H3].set(p["w3s"])
    w3 = w3.at[C:C + F, :H3].set(p["w3f"])

    vs = jnp.zeros((8, OUT_LANES), jnp.float32)
    vs = vs.at[R_B1A, :MLP1_DIMS[0]].set(p["b1a"].reshape(-1))
    vs = vs.at[R_B1B, :G].set(p["b1b"].reshape(-1))
    vs = vs.at[R_B2A_BA1, :MLP2_DIMS[0]].set(p["b2a"].reshape(-1))   # fused bias row
    vs = vs.at[R_B2A_BA1, C:C + A].set(p["ba1"].reshape(-1))
    vs = vs.at[R_B2B, :F].set(p["b2b"].reshape(-1))
    vs = vs.at[R_B3A, :H3].set(p["b3a"].reshape(-1))
    vs = vs.at[R_WA2, :A].set(p["wa2"].reshape(-1))    # attention layer-2 weight row
    vs = vs.at[R_W3B, :H3].set(p["w3b"].reshape(-1))   # mlp3 layer-2 weight row
    vs = vs.at[R_SCAL, 0].set(p["ba2"].reshape(()))
    vs = vs.at[R_SCAL, 1].set(p["b3b"].reshape(()))
    return ws, wf, w3, vs


def reference_forward(state, p):
    """Pure-JAX mirror of the PyTorch forward (for verification)."""
    bsz, n, d = state.shape
    self_state = state[:, 0, :SELF_DIM]
    x = state.reshape(-1, d)
    h = jnp.maximum(x @ p["w1a"] + p["b1a"], 0.0)
    h1 = jnp.maximum(h @ p["w1b"] + p["b1b"], 0.0)
    h = jnp.maximum(h1 @ p["w2a"] + p["b2a"], 0.0)
    h2 = h @ p["w2b"] + p["b2b"]
    g = jnp.mean(h1.reshape(bsz, n, -1), axis=1, keepdims=True)
    g = jnp.broadcast_to(g, (bsz, n, G)).reshape(-1, G)
    att_in = jnp.concatenate([h1, g], axis=1)
    wa1 = jnp.concatenate([p["wah"], p["wag"]], axis=0)
    a = jnp.maximum(att_in @ wa1 + p["ba1"], 0.0)
    scores = (a @ p["wa2"] + p["ba2"]).reshape(bsz, n)
    scores_exp = jnp.exp(scores) * (scores != 0.0).astype(jnp.float32)
    wts = scores_exp / jnp.sum(scores_exp, axis=1, keepdims=True)
    feats = h2.reshape(bsz, n, -1)
    weighted = jnp.sum(wts[:, :, None] * feats, axis=1)
    joint = jnp.concatenate([self_state, weighted], axis=1)
    w3 = jnp.concatenate([p["w3s"], p["w3f"]], axis=0)
    j = jnp.maximum(joint @ w3 + p["b3a"], 0.0)
    value = j @ p["w3b"] + p["b3b"]
    return value, wts


def init_params(key):
    """Deterministic synthetic parameters (shapes per ValueNetwork.__init__)."""
    def lin(k, fan_in, fan_out):
        kw, kb = jax.random.split(k)
        scale = 1.0 / jnp.sqrt(jnp.float32(fan_in))
        w = jax.random.uniform(kw, (fan_in, fan_out), jnp.float32, -scale, scale)
        b = jax.random.uniform(kb, (1, fan_out), jnp.float32, -scale, scale)
        return w, b

    ks = jax.random.split(key, 8)
    p = {}
    p["w1a"], p["b1a"] = lin(ks[0], INPUT_DIM, MLP1_DIMS[0])
    p["w1b"], p["b1b"] = lin(ks[1], MLP1_DIMS[0], MLP1_DIMS[1])
    p["w2a"], p["b2a"] = lin(ks[2], G, MLP2_DIMS[0])
    p["w2b"], p["b2b"] = lin(ks[3], MLP2_DIMS[0], MLP2_DIMS[1])
    # attention layer 1 acts on concat([h1, global]) -> split into two blocks
    wa1, p["ba1"] = lin(ks[4], 2 * G, A)
    p["wah"], p["wag"] = wa1[:G], wa1[G:]
    p["wa2"], p["ba2"] = lin(ks[5], A, ATT_DIMS[1])
    # mlp3 layer 1 acts on concat([self_state, weighted_feature]) -> split
    w3, p["b3a"] = lin(ks[6], SELF_DIM + F, H3)
    p["w3s"], p["w3f"] = w3[:SELF_DIM], w3[SELF_DIM:]
    p["w3b"], p["b3b"] = lin(ks[7], H3, MLP3_DIMS[1])
    return p


if __name__ == "__main__":
    key = jax.random.PRNGKey(0)
    kx, kp = jax.random.split(key)
    state = jax.random.normal(kx, (B, N, INPUT_DIM), dtype=jnp.float32)
    params = init_params(kp)

    ws, wf, w3, vs = pack_params(params)     # packed once, reused every call
    state_padded = pad_state(state)

    value, attn = value_network_forward(state_padded, ws, wf, w3, vs)
    value = jax.block_until_ready(value)
    attn = jax.block_until_ready(attn)

    ref_val, ref_wts = reference_forward(state, params)
    ref_val = jax.block_until_ready(ref_val)

    assert value.shape == (B, 1)
    assert attn.shape == (B, N)
    assert jnp.allclose(value, ref_val, rtol=1e-4, atol=1e-4), (value, ref_val)
    assert jnp.allclose(attn, ref_wts, rtol=1e-4, atol=1e-4), (attn, ref_wts)

    # TODO(synk): the PyTorch module mutates self.attention_weights (a
    # .data.cpu().numpy() side effect); the weights are returned here instead,
    # the attribute-mutation itself has no Pallas equivalent.
    print("KERNEL_OK")
</pallas_src>

<mosaic_0001>
module attributes {stable_mosaic.version = 11 : i64} {
  func.func @_value_net_kernel(%arg0: i32, %arg1: memref<2x8x64xf32, #tpu.memory_space<vmem>>, %arg2: memref<4x64x64xf32, #tpu.memory_space<vmem>>, %arg3: memref<64x128xf32, #tpu.memory_space<vmem>>, %arg4: memref<128x64xf32, #tpu.memory_space<vmem>>, %arg5: memref<8x128xf32, #tpu.memory_space<vmem>>, %arg6: memref<2x128xf32, #tpu.memory_space<vmem>>) attributes {dimension_semantics = [#tpu.dimension_semantics<parallel>], iteration_bounds = array<i64: 1>, scalar_prefetch = 0 : i64, scratch_operands = 0 : i64, tpu.core_type = #tpu.core_type<tc>, window_params = [{transform_indices = @transform_0, window_bounds = array<i64: 2, 8, 64>}, {pipeline_mode = #tpu.pipeline_mode<synchronous>, transform_indices = @transform_1, window_bounds = array<i64: 4, 64, 64>}, {pipeline_mode = #tpu.pipeline_mode<synchronous>, transform_indices = @transform_2, window_bounds = array<i64: 64, 128>}, {pipeline_mode = #tpu.pipeline_mode<synchronous>, transform_indices = @transform_3, window_bounds = array<i64: 128, 64>}, {pipeline_mode = #tpu.pipeline_mode<synchronous>, transform_indices = @transform_4, window_bounds = array<i64: 8, 128>}, {transform_indices = @transform_5, window_bounds = array<i64: 2, 128>}]} {
    %c0 = arith.constant 0 : index
    %c0_0 = arith.constant 0 : index
    %c0_1 = arith.constant 0 : index
    %0 = vector.load %arg1[%c0, %c0_0, %c0_1] : memref<2x8x64xf32, #tpu.memory_space<vmem>>, vector<2x8x64xf32>
    %c0_2 = arith.constant 0 : index
    %c0_3 = arith.constant 0 : index
    %1 = vector.load %arg5[%c0_2, %c0_3] : memref<8x128xf32, #tpu.memory_space<vmem>>, vector<8x128xf32>
    %2 = vector.shape_cast %0 : vector<2x8x64xf32> to vector<16x64xf32>
    %c0_4 = arith.constant 0 : index
    %c0_5 = arith.constant 0 : index
    %c0_6 = arith.constant 0 : index
    %3 = vector.load %arg2[%c0_4, %c0_5, %c0_6] : memref<4x64x64xf32, #tpu.memory_space<vmem>>, vector<1x64x64xf32>
    %4 = vector.shape_cast %3 : vector<1x64x64xf32> to vector<64x64xf32>
    %cst = arith.constant dense<0.000000e+00> : vector<16x64xf32>
    %5 = tpu.matmul %2, %4, %cst {dimension_numbers = #tpu.dot_dimension_numbers<[1], [0], [0], [1], [0, 0, 1, 1], [], []>} : vector<16x64xf32>, vector<64x64xf32>, vector<16x64xf32> -> vector<16x64xf32>
    %6 = vector.extract_strided_slice %1 {offsets = [0, 0], sizes = [1, 64], strides = [1, 1]} : vector<8x128xf32> to vector<1x64xf32>
    %7 = vector.broadcast %6 : vector<1x64xf32> to vector<16x64xf32>
    %8 = arith.addf %5, %7 : vector<16x64xf32>
    %cst_7 = arith.constant 0.000000e+00 : f32
    %9 = vector.broadcast %cst_7 : f32 to vector<16x64xf32>
    %10 = arith.maximumf %8, %9 : vector<16x64xf32>
    %c1 = arith.constant 1 : index
    %c0_8 = arith.constant 0 : index
    %c0_9 = arith.constant 0 : index
    %11 = vector.load %arg2[%c1, %c0_8, %c0_9] : memref<4x64x64xf32, #tpu.memory_space<vmem>>, vector<1x64x64xf32>
    %12 = vector.shape_cast %11 : vector<1x64x64xf32> to vector<64x64xf32>
    %cst_10 = arith.constant dense<0.000000e+00> : vector<16x64xf32>
    %13 = tpu.matmul %10, %12, %cst_10 {dimension_numbers = #tpu.dot_dimension_numbers<[1], [0], [0], [1], [0, 0, 1, 1], [], []>} : vector<16x64xf32>, vector<64x64xf32>, vector<16x64xf32> -> vector<16x64xf32>
    %14 = vector.extract_strided_slice %1 {offsets = [1, 0], sizes = [1, 64], strides = [1, 1]} : vector<8x128xf32> to vector<1x64xf32>
    %15 = vector.broadcast %14 : vector<1x64xf32> to vector<16x64xf32>
    %16 = arith.addf %13, %15 : vector<16x64xf32>
    %cst_11 = arith.constant 0.000000e+00 : f32
    %17 = vector.broadcast %cst_11 : f32 to vector<16x64xf32>
    %18 = arith.maximumf %16, %17 : vector<16x64xf32>
    %c0_12 = arith.constant 0 : index
    %c0_13 = arith.constant 0 : index
    %19 = vector.load %arg3[%c0_12, %c0_13] : memref<64x128xf32, #tpu.memory_space<vmem>>, vector<64x128xf32>
    %cst_14 = arith.constant dense<0.000000e+00> : vector<16x128xf32>
    %20 = tpu.matmul %18, %19, %cst_14 {dimension_numbers = #tpu.dot_dimension_numbers<[1], [0], [0], [1], [0, 0, 1, 1], [], []>} : vector<16x64xf32>, vector<64x128xf32>, vector<16x128xf32> -> vector<16x128xf32>
    %21 = vector.extract_strided_slice %1 {offsets = [2, 0], sizes = [1, 128], strides = [1, 1]} : vector<8x128xf32> to vector<1x128xf32>
    %22 = vector.broadcast %21 : vector<1x128xf32> to vector<16x128xf32>
    %23 = arith.addf %20, %22 : vector<16x128xf32>
    %24 = vector.extract_strided_slice %23 {offsets = [0, 0], sizes = [16, 64], strides = [1, 1]} : vector<16x128xf32> to vector<16x64xf32>
    %cst_15 = arith.constant 0.000000e+00 : f32
    %25 = vector.broadcast %cst_15 : f32 to vector<16x64xf32>
    %26 = arith.maximumf %24, %25 : vector<16x64xf32>
    %27 = vector.extract_strided_slice %23 {offsets = [0, 64], sizes = [16, 64], strides = [1, 1]} : vector<16x128xf32> to vector<16x64xf32>
    %c2 = arith.constant 2 : index
    %c0_16 = arith.constant 0 : index
    %c0_17 = arith.constant 0 : index
    %28 = vector.load %arg2[%c2, %c0_16, %c0_17] : memref<4x64x64xf32, #tpu.memory_space<vmem>>, vector<1x64x64xf32>
    %29 = vector.shape_cast %28 : vector<1x64x64xf32> to vector<64x64xf32>
    %cst_18 = arith.constant dense<0.000000e+00> : vector<16x64xf32>
    %30 = tpu.matmul %26, %29, %cst_18 {dimension_numbers = #tpu.dot_dimension_numbers<[1], [0], [0], [1], [0, 0, 1, 1], [], []>} : vector<16x64xf32>, vector<64x64xf32>, vector<16x64xf32> -> vector<16x64xf32>
    %31 = vector.extract_strided_slice %1 {offsets = [3, 0], sizes = [1, 64], strides = [1, 1]} : vector<8x128xf32> to vector<1x64xf32>
    %32 = vector.broadcast %31 : vector<1x64xf32> to vector<16x64xf32>
    %33 = arith.addf %30, %32 : vector<16x64xf32>
    %34 = vector.shape_cast %18 : vector<16x64xf32> to vector<2x8x64xf32>
    %cst_19 = arith.constant dense<0.000000e+00> : vector<2x64xf32>
    %35 = vector.multi_reduction <add>, %34, %cst_19 [1] : vector<2x8x64xf32> to vector<2x64xf32>
    %cst_20 = arith.constant 8.000000e+00 : f32
    %36 = vector.broadcast %cst_20 : f32 to vector<2x64xf32>
    %37 = arith.divf %35, %36 : vector<2x64xf32>
    %c3 = arith.constant 3 : index
    %c0_21 = arith.constant 0 : index
    %c0_22 = arith.constant 0 : index
    %38 = vector.load %arg2[%c3, %c0_21, %c0_22] : memref<4x64x64xf32, #tpu.memory_space<vmem>>, vector<1x64x64xf32>
    %39 = vector.shape_cast %38 : vector<1x64x64xf32> to vector<64x64xf32>
    %cst_23 = arith.constant dense<0.000000e+00> : vector<2x64xf32>
    %40 = tpu.matmul %37, %39, %cst_23 {dimension_numbers = #tpu.dot_dimension_numbers<[1], [0], [0], [1], [0, 0, 1, 1], [], []>} : vector<2x64xf32>, vector<64x64xf32>, vector<2x64xf32> -> vector<2x64xf32>
    %41 = vector.shape_cast %27 : vector<16x64xf32> to vector<2x8x64xf32>
    %42 = vector.shape_cast %40 : vector<2x64xf32> to vector<2x1x64xf32>
    %43 = vector.broadcast %42 : vector<2x1x64xf32> to vector<2x8x64xf32>
    %44 = arith.addf %41, %43 : vector<2x8x64xf32>
    %cst_24 = arith.constant 0.000000e+00 : f32
    %45 = vector.broadcast %cst_24 : f32 to vector<2x8x64xf32>
    %46 = arith.maximumf %44, %45 : vector<2x8x64xf32>
    %47 = vector.extract_strided_slice %1 {offsets = [5, 0], sizes = [1, 64], strides = [1, 1]} : vector<8x128xf32> to vector<1x64xf32>
    %48 = vector.extract_strided_slice %1 {offsets = [7, 0], sizes = [1, 1], strides = [1, 1]} : vector<8x128xf32> to vector<1x1xf32>
    %49 = vector.shape_cast %47 : vector<1x64xf32> to vector<1x1x64xf32>
    %50 = vector.broadcast %49 : vector<1x1x64xf32> to vector<2x8x64xf32>
    %51 = arith.mulf %46, %50 : vector<2x8x64xf32>
    %cst_25 = arith.constant dense<0.000000e+00> : vector<2x8xf32>
    %52 = vector.multi_reduction <add>, %51, %cst_25 [2] : vector<2x8x64xf32> to vector<2x8xf32>
    %53 = vector.shape_cast %52 : vector<2x8xf32> to vector<2x8x1xf32>
    %54 = vector.shape_cast %48 : vector<1x1xf32> to vector<1x1x1xf32>
    %55 = vector.broadcast %54 : vector<1x1x1xf32> to vector<2x8x1xf32>
    %56 = arith.addf %53, %55 : vector<2x8x1xf32>
    %57 = math.exp %56 : vector<2x8x1xf32>
    %cst_26 = arith.constant 0.000000e+00 : f32
    %58 = vector.broadcast %cst_26 : f32 to vector<2x8x1xf32>
    %59 = arith.cmpf one, %56, %58 : vector<2x8x1xf32>
    %60 = arith.extui %59 : vector<2x8x1xi1> to vector<2x8x1xi32>
    %61 = arith.sitofp %60 : vector<2x8x1xi32> to vector<2x8x1xf32>
    %62 = arith.mulf %57, %61 : vector<2x8x1xf32>
    %cst_27 = arith.constant dense<0.000000e+00> : vector<2x1xf32>
    %63 = vector.multi_reduction <add>, %62, %cst_27 [1] : vector<2x8x1xf32> to vector<2x1xf32>
    %64 = vector.shape_cast %63 : vector<2x1xf32> to vector<2x1x1xf32>
    %65 = vector.broadcast %64 : vector<2x1x1xf32> to vector<2x8x1xf32>
    %66 = arith.divf %62, %65 : vector<2x8x1xf32>
    %67 = vector.shape_cast %33 : vector<16x64xf32> to vector<2x8x64xf32>
    %68 = vector.broadcast %66 : vector<2x8x1xf32> to vector<2x8x64xf32>
    %69 = arith.mulf %68, %67 : vector<2x8x64xf32>
    %cst_28 = arith.constant dense<0.000000e+00> : vector<2x64xf32>
    %70 = vector.multi_reduction <add>, %69, %cst_28 [1] : vector<2x8x64xf32> to vector<2x64xf32>
    %71 = vector.extract_strided_slice %0 {offsets = [0, 0, 0], sizes = [2, 1, 64], strides = [1, 1, 1]} : vector<2x8x64xf32> to vector<2x1x64xf32>
    %72 = vector.shape_cast %71 : vector<2x1x64xf32> to vector<2x64xf32>
    %73 = tpu.concatenate %72, %70 in 1 : vector<2x64xf32>, vector<2x64xf32> -> vector<2x128xf32>
    %c0_29 = arith.constant 0 : index
    %c0_30 = arith.constant 0 : index
    %74 = vector.load %arg4[%c0_29, %c0_30] : memref<128x64xf32, #tpu.memory_space<vmem>>, vector<128x64xf32>
    %cst_31 = arith.constant dense<0.000000e+00> : vector<2x64xf32>
    %75 = tpu.matmul %73, %74, %cst_31 {dimension_numbers = #tpu.dot_dimension_numbers<[1], [0], [0], [1], [0, 0, 1, 1], [], []>} : vector<2x128xf32>, vector<128x64xf32>, vector<2x64xf32> -> vector<2x64xf32>
    %76 = vector.extract_strided_slice %1 {offsets = [4, 0], sizes = [1, 64], strides = [1, 1]} : vector<8x128xf32> to vector<1x64xf32>
    %77 = vector.broadcast %76 : vector<1x64xf32> to vector<2x64xf32>
    %78 = arith.addf %75, %77 : vector<2x64xf32>
    %cst_32 = arith.constant 0.000000e+00 : f32
    %79 = vector.broadcast %cst_32 : f32 to vector<2x64xf32>
    %80 = arith.maximumf %78, %79 : vector<2x64xf32>
    %81 = vector.extract_strided_slice %1 {offsets = [6, 0], sizes = [1, 64], strides = [1, 1]} : vector<8x128xf32> to vector<1x64xf32>
    %82 = vector.extract_strided_slice %1 {offsets = [7, 1], sizes = [1, 1], strides = [1, 1]} : vector<8x128xf32> to vector<1x1xf32>
    %83 = vector.broadcast %81 : vector<1x64xf32> to vector<2x64xf32>
    %84 = arith.mulf %80, %83 : vector<2x64xf32>
    %cst_33 = arith.constant dense<0.000000e+00> : vector<2xf32>
    %85 = vector.multi_reduction <add>, %84, %cst_33 [1] : vector<2x64xf32> to vector<2xf32>
    %86 = vector.shape_cast %85 : vector<2xf32> to vector<2x1xf32>
    %87 = vector.broadcast %82 : vector<1x1xf32> to vector<2x1xf32>
    %88 = arith.addf %86, %87 : vector<2x1xf32>
    %89 = vector.shape_cast %66 : vector<2x8x1xf32> to vector<2x8xf32>
    %cst_34 = arith.constant 0.000000e+00 : f32
    %90 = vector.broadcast %cst_34 : f32 to vector<2x119xf32>
    %91 = tpu.concatenate %88, %89, %90 in 1 : vector<2x1xf32>, vector<2x8xf32>, vector<2x119xf32> -> vector<2x128xf32>
    %c0_35 = arith.constant 0 : index
    %c0_36 = arith.constant 0 : index
    %92 = vector.load %arg6[%c0_35, %c0_36] : memref<2x128xf32, #tpu.memory_space<vmem>>, vector<2x128xf32>
    tpu.vector_store %arg6[%c0_35, %c0_36], %91 {strides = array<i32>} : memref<2x128xf32, #tpu.memory_space<vmem>>, vector<2x128xf32>,
    return
  }
  func.func @transform_0(%arg0: i32) -> (i32, i32, i32) {
    %c0_i32 = arith.constant 0 : i32
    %c0_i32_0 = arith.constant 0 : i32
    %c0_i32_1 = arith.constant 0 : i32
    return %arg0, %c0_i32, %c0_i32_0 : i32, i32, i32
  }
  func.func @transform_1(%arg0: i32) -> (i32, i32, i32) {
    %c0_i32 = arith.constant 0 : i32
    %c0_i32_0 = arith.constant 0 : i32
    %c0_i32_1 = arith.constant 0 : i32
    %c0_i32_2 = arith.constant 0 : i32
    return %c0_i32, %c0_i32_0, %c0_i32_1 : i32, i32, i32
  }
  func.func @transform_2(%arg0: i32) -> (i32, i32) {
    %c0_i32 = arith.constant 0 : i32
    %c0_i32_0 = arith.constant 0 : i32
    %c0_i32_1 = arith.constant 0 : i32
    return %c0_i32, %c0_i32_0 : i32, i32
  }
  func.func @transform_3(%arg0: i32) -> (i32, i32) {
    %c0_i32 = arith.constant 0 : i32
    %c0_i32_0 = arith.constant 0 : i32
    %c0_i32_1 = arith.constant 0 : i32
    return %c0_i32, %c0_i32_0 : i32, i32
  }
  func.func @transform_4(%arg0: i32) -> (i32, i32) {
    %c0_i32 = arith.constant 0 : i32
    %c0_i32_0 = arith.constant 0 : i32
    %c0_i32_1 = arith.constant 0 : i32
    return %c0_i32, %c0_i32_0 : i32, i32
  }
  func.func @transform_5(%arg0: i32) -> (i32, i32) {
    %c0_i32 = arith.constant 0 : i32
    %c0_i32_0 = arith.constant 0 : i32
    return %arg0, %c0_i32 : i32, i32
  }
}

</mosaic_0001>

<bundles_post_ra>
// kernel: tpu_custom_call.1
= control target key start
LH: loop header
LB: loop body
LE: loop exit
PB: predicated region body
PF: predicated region fallthrough
CT: control target
= control target key end

     0   :  { %10 = vsyncpa [#allocation3], 0  ;;  %s1290_s0 = inlined_call_operand.vmem [shape: f32[2,8,64], index: 0, kind: input, shape index: {}]   ;;  %s1291_s1 = inlined_call_operand.hbm [shape: f32[4,64,64], index: 1, kind: input, shape index: {}]   ;;  %s1292_s2 = inlined_call_operand.vmem [shape: f32[64,128], index: 2, kind: input, shape index: {}]   ;;  %s1293_s3 = inlined_call_operand.vmem [shape: f32[128,64], index: 3, kind: input, shape index: {}]   ;;  %s1294_s4 = inlined_call_operand.vmem [shape: f32[8,128], index: 4, kind: input, shape index: {}]   ;;  %s1295_s5 = inlined_call_operand.hbm [shape: f32[2,128], index: 5, kind: output, shape index: {}]  }
   0x1   :  { %11 = vsyncpa [#allocation4], 0  ;;  %s1067_s18 = smov [#allocation2]  }
   0x2   :  { %s19_s19 = sshll.u32 %s1067_s18, 4  ;;  %s20_s19 = int_to_ptr.vmem [resolvable:$true] %s19_s19 }
   0x3   :  { %s1031_s20 = scalar_lea.vmem %s20_s19, 4096  ;;  %p1036_p1 = scmp.lt.s32.totalorder %s20_s19, %s20_s19 }
   0x4   :  { %p1032_p0 = scmp.ne.s32.totalorder %s20_s19, %s1031_s20  ;;  %p1037_p2 = scmp.lt.s32.totalorder %s1031_s20, %s1031_s20 }
   0x6   :  { %p1038_p3 = por %p1037_p2, %p1036_p1 }
   0x8   :  { %p1039_p4 = pnand %p1038_p3, %p1032_p0 }
   0xa   :  { %1042 = shalt.err (!%p1039_p4)
}
   0xb   :  { %s1068_s21 = smov 128   ;;  %s1069_s22 = smov 8  }
   0xc   :  { %25 = dma.hbm_to_vmem [thread:$0]  %s1291_s1, 4096, %s20_s19, [#allocation3], %s1068_s21, %s1068_s21, %s1069_s22  }
   0xd   :  { %1063 = dma.done.wait [#allocation3], 4096  }
   0xe   :  { %1064 = vsyncadd [#allocation3], 4294963200  ;;  %v45_v0 = vld [vmem:[#allocation2 + $0x38] sm:$0xff]  ;;  %v44_v1 = vld [vmem:[#allocation2 + $0x30] sm:$0xff]  ;;  %vm50_vm0 = vcmask 523264   ;;  %vm447_vm1 = vcmask 1041409   ;;  %v46_v25 = vlaneseq }
   0xf   :  { %873 = vmatprep.subr.mxu0 %v45_v0  ;;  %v43_v2 = vld [vmem:[#allocation2 + $0x28] sm:$0xff]  ;;  %v35_v3 = vld [vmem:[%s1290_s0] sm:$0xff]  ;;  %v142_v5 = vld [vmem:[#allocation2 + $0x78] sm:$0xff]  ;;  %v1070_v39 = vmov 0.0   ;;  %vm1071_vm2 = vmmov 0   ;;  %vm604_vm4 = vcmask 7168  }
  0x10   :  { %874 = vmatpush3.msra.mxu0 %v45_v0  ;;  %v36_v4 = vld [vmem:[%s1290_s0 + $0x8] sm:$0xff]  ;;  %889 = vmatprep.mubr.msk.f32.mxu0 %vm50_vm0, %v35_v3  ;;  %v141_v6 = vld [vmem:[#allocation2 + $0x70] sm:$0xff]  ;;  %v42_v7 = vld [vmem:[#allocation2 + $0x20] sm:$0xff]  ;;  %v1137_v26 = vshrl.u32 %v46_v25, 7  ;;  %vm755_vm6 = vcmask 517120   ;;  %vm778_vm7 = vcmask 72704  }
  0x11   :  { %875 = vmatprep.subr.mxu0 %v44_v1  ;;  %v649_v8 = vrot.slane %v36_v4, 7  ;;  %892 = vmatprep.subr.mxu1 %v142_v5  ;;  %v140_v9 = vld [vmem:[#allocation2 + $0x68] sm:$0xff]  ;;  %v41_v10 = vld [vmem:[#allocation2 + $0x18] sm:$0xff]  ;;  %v139_v12 = vld [vmem:[#allocation2 + $0x60] sm:$0xff] }
  0x12   :  { %876 = vmatpush3.msra.mxu0 %v44_v1  ;;  %893 = vmatpush3.msra.mxu1 %v142_v5  ;;  %v40_v13 = vld [vmem:[#allocation2 + $0x10] sm:$0xff]  ;;  %v39_v14 = vld [vmem:[#allocation2 + $0x8] sm:$0xff]  ;;  %v38_v15 = vld [vmem:[#allocation2] sm:$0xff]  ;;  %v1140_v27 = vsub.s32 0, %v1137_v26  ;;  %v145_v44 = vsub.s32 1, %v1137_v26 }
  0x13   :  { %877 = vmatprep.subr.mxu0 %v43_v2  ;;  %v1118_v11 = vsel %vm447_vm1, %v649_v8, %v35_v3  ;;  %894 = vmatprep.subr.mxu1 %v141_v6  ;;  %v138_v16 = vld [vmem:[#allocation2 + $0x58] sm:$0xff]  ;;  %v137_v17 = vld [vmem:[#allocation2 + $0x50] sm:$0xff]  ;;  %v136_v18 = vld [vmem:[#allocation2 + $0x48] sm:$0xff] }
  0x14   :  { %878 = vmatpush3.msra.mxu0 %v43_v2  ;;  %895 = vmatpush3.msra.mxu1 %v141_v6  ;;  %v135_v19 = vld [vmem:[#allocation2 + $0x40] sm:$0xff]  ;;  %v237_v20 = vld [vmem:[%s1292_s2 + $0x38] sm:$0xff]  ;;  %v236_v21 = vld [vmem:[%s1292_s2 + $0x30] sm:$0xff] }
  0x15   :  { %879 = vmatprep.subr.mxu0 %v42_v7  ;;  %896 = vmatprep.subr.mxu1 %v140_v9  ;;  %v235_v22 = vld [vmem:[%s1292_s2 + $0x28] sm:$0xff]  ;;  %v234_v23 = vld [vmem:[%s1292_s2 + $0x20] sm:$0xff]  ;;  %v233_v24 = vld [vmem:[%s1292_s2 + $0x18] sm:$0xff] }
  0x16   :  { %880 = vmatpush3.msra.mxu0 %v42_v7  ;;  %897 = vmatpush3.msra.mxu1 %v140_v9  ;;  %v1145_v28 = vld [vmem:[%s1294_s4] sm:$0xff]  ;;  %v232_v36 = vld [vmem:[%s1292_s2 + $0x10] sm:$0xff]  ;;  %v231_v37 = vld [vmem:[%s1292_s2 + $0x8] sm:$0xff] }
  0x17   :  { %881 = vmatprep.subr.mxu0 %v41_v10  ;;  %898 = vmatprep.subr.mxu1 %v139_v12  ;;  %v49_v29 = vrot.slane %v1145_v28, %v1140_v27  ;;  %v230_v38 = vld [vmem:[%s1292_s2] sm:$0xff]  ;;  %v333_v40 = vld [vmem:[#allocation2 + $0xb8] sm:$0xff]  ;;  %v332_v41 = vld [vmem:[#allocation2 + $0xb0] sm:$0xff]  ;;  %v146_v45 = vrot.slane %v1145_v28, %v145_v44  ;;  %s1072_s2 = smov 64  }
  0x18   :  { %882 = vmatpush3.msra.mxu0 %v41_v10  ;;  %899 = vmatpush3.msra.mxu1 %v139_v12  ;;  %v331_v42 = vld [vmem:[#allocation2 + $0xa8] sm:$0xff]  ;;  %v330_v43 = vld [vmem:[#allocation2 + $0xa0] sm:$0xff]  ;;  %v444_v54 = vld [vmem:[#allocation2 + $0xf8] sm:$0xff] }
  0x19   :  { %883 = vmatprep.subr.mxu0 %v40_v13  ;;  %900 = vmatprep.subr.mxu1 %v138_v16  ;;  %v443_v58 = vld [vmem:[#allocation2 + $0xf0] sm:$0xff]  ;;  %v442_v61 = vld [vmem:[#allocation2 + $0xe8] sm:$0xff]  ;;  %v441_v0 = vld [vmem:[#allocation2 + $0xe0] sm:$0xff] }
  0x1a   :  { %884 = vmatpush3.msra.mxu0 %v40_v13  ;;  %901 = vmatpush3.msra.mxu1 %v138_v16  ;;  %v440_v3 = vld [vmem:[#allocation2 + $0xd8] sm:$0xff]  ;;  %v439_v6 = vld [vmem:[#allocation2 + $0xd0] sm:$0xff]  ;;  %v438_v8 = vld [vmem:[#allocation2 + $0xc8] sm:$0xff] }
  0x1b   :  { %885 = vmatprep.subr.mxu0 %v39_v14  ;;  %902 = vmatprep.subr.mxu1 %v137_v17  ;;  %v437_v12 = vld [vmem:[#allocation2 + $0xc0] sm:$0xff]  ;;  %v327_v16 = vld [vmem:[#allocation2 + $0x88] sm:$0xff] }
  0x1c   :  { %886 = vmatpush3.msra.mxu0 %v39_v14  ;;  %903 = vmatpush3.msra.mxu1 %v137_v17  ;;  %v329_v14 = vld [vmem:[#allocation2 + $0x98] sm:$0xff]  ;;  %v326_v17 = vld [vmem:[#allocation2 + $0x80] sm:$0xff] }
  0x1d   :  { %887 = vmatprep.subr.mxu0 %v38_v15  ;;  %904 = vmatprep.subr.mxu1 %v136_v18 }
  0x1e   :  { %888 = vmatpush3.msra.mxu0 %v38_v15  ;;  %905 = vmatpush3.msra.mxu1 %v136_v18  ;;  %v328_v15 = vld [vmem:[#allocation2 + $0x90] sm:$0xff]  ;;  %v564_v18 = vsub.s32 5, %v1137_v26 }
  0x1f   :  { %890 = vmatmul.mubr.msk.f32.vlgmr.msra.gmra.mxu0 %vm50_vm0, %v36_v4  ;;  %906 = vmatprep.subr.mxu1 %v135_v19 }
  0x20   :  { %907 = vmatpush3.msra.mxu1 %v135_v19  ;;  %911 = vmatprep.subr.mxu0 %v237_v20  ;;  %v565_v19 = vrot.slane %v1145_v28, %v564_v18 }
  0x21   :  { %912 = vmatpush3.msra.mxu0 %v237_v20  ;;  %930 = vmatprep.subr.mxu1 %v333_v40  ;;  %v240_v20 = vsub.s32 2, %v1137_v26 }
  0x22   :  { %913 = vmatprep.subr.mxu0 %v236_v21  ;;  %567 = vrot.lane.b32.xlu1 %v565_v19, %s1072_s2 }
  0x23   :  { %914 = vmatpush3.msra.mxu0 %v236_v21  ;;  %v241_v21 = vrot.slane %v1145_v28, %v240_v20 }
  0x24   :  { %915 = vmatprep.subr.mxu0 %v235_v22 }
  0x25   :  { %916 = vmatpush3.msra.mxu0 %v235_v22 }
  0x26   :  { %917 = vmatprep.subr.mxu0 %v234_v23 }
  0x27   :  { %918 = vmatpush3.msra.mxu0 %v234_v23 }
  0x28   :  { %919 = vmatprep.subr.mxu0 %v233_v24 }
  0x29   :  { %920 = vmatpush3.msra.mxu0 %v233_v24 }
  0x2a   :  { %921 = vmatprep.subr.mxu0 %v232_v36 }
  0x2b   :  { %922 = vmatpush3.msra.mxu0 %v232_v36 }
  0x2c   :  { %923 = vmatprep.subr.mxu0 %v231_v37 }
  0x2d   :  { %924 = vmatpush3.msra.mxu0 %v231_v37 }
  0x2e   :  { %925 = vmatprep.subr.mxu0 %v230_v38 }
  0x2f   :  { %926 = vmatpush3.msra.mxu0 %v230_v38 }
  0x30   :  { %949 = vmatprep.subr.mxu0 %v1070_v39 }
  0xdf   :  { %v891_v30 = vpop.f32.mrf.mxu0 }
  0xe0   :  { %v129_v31 = vadd.f32 %v891_v30, %v49_v29 }
  0xe1   :  { %v123_v32 = vpop.f32.mrf.mxu0 }
  0xe2   :  { %v124_v33 = vadd.f32 %v123_v32, %v49_v29  ;;  %v133_v35 = vmax.f32 %v129_v31, 0.0  ;;  %v1073_v31 = vmov 1966171168  }
  0xe3   :  { %v523_v32 = vunpack.c.l.s4 %v1073_v31  ;;  %v674_v31 = vld [vmem:[%s1293_s3 + $0x78] sm:$0xff] }
  0xe4   :  { %v132_v34 = vmax.f32 %v124_v33, 0.0 }
  0xe6   :  { %908 = vmatprep.mubr.msk.f32.mxu1 %vm50_vm0, %v132_v34  ;;  %v524_v34 = vunpack.c.0.s8 %v523_v32  ;;  %v673_v32 = vld [vmem:[%s1293_s3 + $0x70] sm:$0xff] }
  0xe7   :  { %909 = vmatmul.mubr.msk.f32.vlgmr.msra.gmra.mxu1 %vm50_vm0, %v133_v35 }
  0xe8   :  { %931 = vmatpush3.msra.mxu1 %v333_v40  ;;  %v527_v35 = vsub.s32 %v524_v34, %v1137_v26  ;;  %v671_v34 = vld [vmem:[%s1293_s3 + $0x60] sm:$0xff] }
  0xe9   :  { %932 = vmatprep.subr.mxu1 %v332_v41 }
  0xea   :  { %933 = vmatpush3.msra.mxu1 %v332_v41 }
  0xeb   :  { %934 = vmatprep.subr.mxu1 %v331_v42 }
  0xec   :  { %935 = vmatpush3.msra.mxu1 %v331_v42 }
  0xed   :  { %936 = vmatprep.subr.mxu1 %v330_v43 }
  0xee   :  { %937 = vmatpush3.msra.mxu1 %v330_v43 }
  0xef   :  { %938 = vmatprep.subr.mxu1 %v329_v14 }
  0xf0   :  { %939 = vmatpush3.msra.mxu1 %v329_v14 }
  0xf1   :  { %940 = vmatprep.subr.mxu1 %v328_v15 }
  0xf2   :  { %941 = vmatpush3.msra.mxu1 %v328_v15 }
  0xf3   :  { %942 = vmatprep.subr.mxu1 %v327_v16 }
  0xf4   :  { %943 = vmatpush3.msra.mxu1 %v327_v16 }
  0xf5   :  { %944 = vmatprep.subr.mxu1 %v326_v17 }
  0xf6   :  { %945 = vmatpush3.msra.mxu1 %v326_v17 }
  0xf7   :  { %968 = vmatprep.subr.mxu1 %v1070_v39 }
 0x1a7   :  { %v910_v46 = vpop.f32.mrf.mxu1 }
 0x1a8   :  { %v225_v47 = vadd.f32 %v910_v46, %v146_v45 }
 0x1a9   :  { %v219_v48 = vpop.f32.mrf.mxu1 }
 0x1aa   :  { %v229_v49 = vmax.f32 %v225_v47, 0.0  ;;  %v220_v50 = vadd.f32 %v219_v48, %v146_v45  ;;  %v568_v47 = vpop.permute.xlu1 %567 }
 0x1ac   :  { %v426_v51 = vsel %vm50_vm0, %v229_v49, 0.0  ;;  %v228_v52 = vmax.f32 %v220_v50, 0.0 }
 0x1ad   :  { %v427_v53 = vrot.slane %v426_v51, 4 }
 0x1ae   :  { %v419_v55 = vsel %vm50_vm0, %v228_v52, 0.0  ;;  %927 = vmatprep.mubr.msk.f32.mxu0 %vm50_vm0, %v228_v52 }
 0x1af   :  { %v428_v56 = vadd.f32 %v427_v53, %v426_v51  ;;  %v420_v57 = vrot.slane %v419_v55, 4  ;;  %928 = vmatmul.mubr.msk.f32.vlgmr.msra.gmra.mxu0 %vm50_vm0, %v229_v49 }
 0x1b0   :  { %950 = vmatpush3.msra.mxu0 %v444_v54  ;;  %965 = vmatprep.mubr.msk.f32.mxu0 %vm1071_vm2, %v1070_v39 }
 0x1b1   :  { %v429_v59 = vrot.slane %v428_v56, 2  ;;  %v421_v60 = vadd.f32 %v420_v57, %v419_v55  ;;  %951 = vmatprep.subr.mxu0 %v1070_v39  ;;  %v1074_v57 = vmov 0  }
 0x1b2   :  { %952 = vmatpush3.msra.mxu0 %v443_v58  ;;  %1013 = vset.pattern.permute.xlu0 %v1074_v57  ;;  %v588_v58 = vsub.s32 7, %v1137_v26 }
 0x1b3   :  { %v430_v62 = vadd.f32 %v429_v59, %v428_v56  ;;  %v422_v63 = vrot.slane %v421_v60, 2  ;;  %953 = vmatprep.subr.mxu0 %v1070_v39  ;;  %1014 = vset.pattern.permute.xlu1 %v1074_v57 }
 0x1b4   :  { %954 = vmatpush3.msra.mxu0 %v442_v61  ;;  %v1199_v59 = vrot.slane %v1145_v28, %v588_v58 }
 0x1b5   :  { %v431_v1 = vrot.slane %v430_v62, 1  ;;  %v423_v2 = vadd.f32 %v422_v63, %v421_v60  ;;  %955 = vmatprep.subr.mxu0 %v1070_v39 }
 0x1b6   :  { %956 = vmatpush3.msra.mxu0 %v441_v0 }
 0x1b7   :  { %v432_v4 = vadd.f32 %v431_v1, %v430_v62  ;;  %v424_v5 = vrot.slane %v423_v2, 1  ;;  %957 = vmatprep.subr.mxu0 %v1070_v39 }
 0x1b8   :  { %958 = vmatpush3.msra.mxu0 %v440_v3 }
 0x1b9   :  { %v425_v7 = vadd.f32 %v424_v5, %v423_v2  ;;  %959 = vmatprep.subr.mxu0 %v1070_v39  ;;  %v435_v9 = vmul.f32 0.125, %v432_v4 }
 0x1ba   :  { %960 = vmatpush3.msra.mxu0 %v439_v6 }
 0x1bb   :  { %v434_v10 = vmul.f32 0.125, %v425_v7  ;;  %961 = vmatprep.subr.mxu0 %v1070_v39 }
 0x1bc   :  { %962 = vmatpush3.msra.mxu0 %v438_v8 }
 0x1bd   :  { %963 = vmatprep.subr.mxu0 %v1070_v39  ;;  %v448_v13 = vsel %vm447_vm1, %v435_v9, %v434_v10 }
 0x1be   :  { %964 = vmatpush3.msra.mxu0 %v437_v12 }
 0x1bf   :  { %966 = vmatmul.mubr.msk.f32.vlgmr.msra.gmra.mxu0 %vm50_vm0, %v448_v13 }
 0x26f   :  { %v929_v22 = vpop.f32.mrf.mxu0 }
 0x270   :  { %v320_v23 = vadd.f32 %v929_v22, %v241_v21 }
 0x271   :  { %v314_v24 = vpop.f32.mrf.mxu0 }
 0x272   :  { %v315_v29 = vadd.f32 %v314_v24, %v241_v21  ;;  %v324_v33 = vmax.f32 %v320_v23, 0.0 }
 0x274   :  { %v323_v30 = vmax.f32 %v315_v29, 0.0 }
 0x276   :  { %946 = vmatprep.mubr.msk.f32.mxu1 %vm50_vm0, %v323_v30 }
 0x277   :  { %947 = vmatmul.mubr.msk.f32.vlgmr.msra.gmra.mxu1 %vm50_vm0, %v324_v33  ;;  %v672_v33 = vld [vmem:[%s1293_s3 + $0x68] sm:$0xff] }
 0x278   :  { %1000 = vmatprep.mubr.msk.f32.mxu1 %vm1071_vm2, %v1070_v39  ;;  %969 = vmatpush3.msra.mxu1 %v674_v31 }
 0x279   :  { %970 = vmatprep.subr.mxu1 %v1070_v39 }
 0x27a   :  { %971 = vmatpush3.msra.mxu1 %v673_v32 }
 0x27b   :  { %972 = vmatprep.subr.mxu1 %v1070_v39 }
 0x27c   :  { %973 = vmatpush3.msra.mxu1 %v672_v33 }
 0x27d   :  { %974 = vmatprep.subr.mxu1 %v1070_v39 }
 0x27e   :  { %975 = vmatpush3.msra.mxu1 %v671_v34 }
 0x27f   :  { %v517_v36 = vpop.f32.mrf.mxu0  ;;  %976 = vmatprep.subr.mxu1 %v1070_v39 }
 0x280   :  { %v528_v37 = vrot.slane %v517_v36, %v527_v35  ;;  %v669_v36 = vld [vmem:[%s1293_s3 + $0x50] sm:$0xff] }
 0x281   :  { %v967_v38 = vpop.f32.mrf.mxu0 }
 0x282   :  { %v529_v40 = vcombine.high %v528_v37, %v528_v37  ;;  %v536_v41 = vrot.slane %v528_v37, %v527_v35  ;;  %v668_v37 = vld [vmem:[%s1293_s3 + $0x48] sm:$0xff]  ;;  %v667_v38 = vld [vmem:[%s1293_s3 + $0x40] sm:$0xff] }
 0x284   :  { %v543_v42 = vrot.slane %v529_v40, %v527_v35  ;;  %v547_v43 = vrot.slane %v536_v41, %v1140_v27  ;;  %v670_v35 = vld [vmem:[%s1293_s3 + $0x58] sm:$0xff]  ;;  %v665_v41 = vld [vmem:[%s1293_s3 + $0x30] sm:$0xff] }
 0x285   :  { %977 = vmatpush3.msra.mxu1 %v670_v35  ;;  %v666_v40 = vld [vmem:[%s1293_s3 + $0x38] sm:$0xff] }
 0x286   :  { %552 = vrot.lane.b32.xlu0 %v547_v43, %s1072_s2  ;;  %v551_v44 = vrot.slane %v543_v42, %v1140_v27  ;;  %978 = vmatprep.subr.mxu1 %v1070_v39  ;;  %v664_v42 = vld [vmem:[%s1293_s3 + $0x28] sm:$0xff]  ;;  %v663_v43 = vld [vmem:[%s1293_s3 + $0x20] sm:$0xff] }
 0x287   :  { %979 = vmatpush3.msra.mxu1 %v669_v36 }
 0x288   :  { %980 = vmatprep.subr.mxu1 %v1070_v39 }
 0x289   :  { %981 = vmatpush3.msra.mxu1 %v668_v37 }
 0x28a   :  { %554 = vrot.lane.b32.xlu0 %v551_v44, %s1072_s2  ;;  %982 = vmatprep.subr.mxu1 %v1070_v39  ;;  %v662_v44 = vld [vmem:[%s1293_s3 + $0x18] sm:$0xff] }
 0x28b   :  { %983 = vmatpush3.msra.mxu1 %v667_v38 }
 0x28c   :  { %984 = vmatprep.subr.mxu1 %v1070_v39 }
 0x28d   :  { %985 = vmatpush3.msra.mxu1 %v666_v40 }
 0x28e   :  { %986 = vmatprep.subr.mxu1 %v1070_v39 }
 0x28f   :  { %987 = vmatpush3.msra.mxu1 %v665_v41 }
 0x290   :  { %988 = vmatprep.subr.mxu1 %v1070_v39 }
 0x291   :  { %989 = vmatpush3.msra.mxu1 %v664_v42 }
 0x292   :  { %990 = vmatprep.subr.mxu1 %v1070_v39 }
 0x293   :  { %991 = vmatpush3.msra.mxu1 %v663_v43 }
 0x294   :  { %992 = vmatprep.subr.mxu1 %v1070_v39 }
 0x295   :  { %993 = vmatpush3.msra.mxu1 %v662_v44 }
 0x296   :  { %994 = vmatprep.subr.mxu1 %v1070_v39 }
 0x2f8   :  { %v553_v45 = vpop.permute.xlu0 %552 }
 0x2f9   :  { %v558_v46 = vadd.f32 %v553_v45, %v315_v29  ;;  %v661_v45 = vld [vmem:[%s1293_s3 + $0x10] sm:$0xff] }
 0x2fa   :  { %995 = vmatpush3.msra.mxu1 %v661_v45 }
 0x2fb   :  { %v560_v48 = vmax.f32 %v558_v46, 0.0  ;;  %v660_v46 = vld [vmem:[%s1293_s3 + $0x8] sm:$0xff]  ;;  %996 = vmatprep.subr.mxu1 %v1070_v39 }
 0x2fc   :  { %v555_v49 = vpop.permute.xlu0 %554  ;;  %997 = vmatpush3.msra.mxu1 %v660_v46 }
 0x2fd   :  { %v570_v50 = vmul.f32 %v568_v47, %v560_v48  ;;  %v559_v51 = vadd.f32 %v555_v49, %v320_v23  ;;  %998 = vmatprep.subr.mxu1 %v1070_v39  ;;  %v336_v48 = vsub.s32 3, %v1137_v26 }
 0x2ff   :  { %v561_v52 = vmax.f32 %v559_v51, 0.0  ;;  %574 = vrot.lane.b32.xlu1 %v570_v50, %s1072_s2  ;;  %v337_v50 = vrot.slane %v1145_v28, %v336_v48 }
 0x301   :  { %v571_v53 = vmul.f32 %v568_v47, %v561_v52 }
 0x303   :  { %576 = vrot.lane.b32.xlu0 %v571_v53, %s1072_s2 }
 0x337   :  { %v948_v47 = vpop.f32.mrf.mxu1 }
 0x339   :  { %v410_v49 = vpop.f32.mrf.mxu1 }
 0x33a   :  { %v411_v51 = vadd.f32 %v410_v49, %v337_v50 }
 0x371   :  { %v575_v54 = vpop.permute.xlu1 %574 }
 0x372   :  { %v580_v55 = vsel %vm50_vm0, %v575_v54, 0.0  ;;  %v416_v54 = vadd.f32 %v948_v47, %v337_v50 }
 0x373   :  { %581 = vadd.xlane.f32.xlu1 %v580_v55 }
 0x375   :  { %v577_v27 = vpop.permute.xlu0 %576 }
 0x376   :  { %v583_v56 = vsel %vm50_vm0, %v577_v27, 0.0 }
 0x377   :  { %584 = vadd.xlane.f32.xlu0 %v583_v56 }
 0x3fc   :  { %v582_v60 = vpop.xlane.xlu1 %581 }
 0x3fd   :  { %v590_v61 = vadd.f32 %v1199_v59, %v582_v60 }
 0x3ff   :  { %v592_v62 = vmul.f32 1.442695, %v590_v61  ;;  %vm596_vm3 = vcmp.ne.f32.partialorder %v590_v61, 0.0 }
 0x400   :  { %v585_v63 = vpop.xlane.xlu0 %584  ;;  %v805_v3 = vsel %vm596_vm3, 1.0, %v1070_v39 }
 0x401   :  { %1015 = vpow2.f32 %v592_v62  ;;  %v591_v0 = vadd.f32 %v1199_v59, %v585_v63 }
 0x403   :  { %v594_v1 = vmul.f32 1.442695, %v591_v0  ;;  %vm597_vm5 = vcmp.ne.f32.partialorder %v591_v0, 0.0 }
 0x404   :  { %v806_v8 = vsel %vm597_vm5, 1.0, %v1070_v39  ;;  %v659_v39 = vld [vmem:[%s1293_s3] sm:$0xff]  ;;  %s1075_s3 = smov 127  }
 0x405   :  { %1017 = vpow2.f32 %v594_v1  ;;  %999 = vmatpush3.msra.mxu1 %v659_v39 }
 0x40e   :  { %v1016_v2 = vpop.eup %1015 }
 0x40f   :  { %v602_v4 = vmul.f32 %v1016_v2, %v805_v3 }
 0x411   :  { %v605_v5 = vsel %vm604_vm4, %v602_v4, 0.0 }
 0x412   :  { %v1018_v6 = vpop.eup %1017  ;;  %v606_v7 = vrot.slane %v605_v5, 4 }
 0x413   :  { %v603_v9 = vmul.f32 %v1018_v6, %v806_v8 }
 0x414   :  { %v607_v10 = vadd.f32 %v606_v7, %v605_v5 }
 0x415   :  { %v612_v12 = vsel %vm604_vm4, %v603_v9, 0.0 }
 0x416   :  { %v608_v13 = vrot.slane %v607_v10, 2  ;;  %v613_v14 = vrot.slane %v612_v12, 4 }
 0x418   :  { %v609_v15 = vadd.f32 %v608_v13, %v607_v10  ;;  %v614_v16 = vadd.f32 %v613_v14, %v612_v12  ;;  %v677_v10 = vsub.s32 4, %v1137_v26  ;;  %v752_v13 = vsub.s32 6, %v1137_v26 }
 0x41a   :  { %v610_v17 = vrot.slane %v609_v15, 1  ;;  %v615_v18 = vrot.slane %v614_v16, 2  ;;  %v678_v12 = vrot.slane %v1145_v28, %v677_v10 }
 0x41c   :  { %v611_v19 = vadd.f32 %v610_v17, %v609_v15  ;;  %v616_v20 = vadd.f32 %v615_v18, %v614_v16  ;;  %v753_v16 = vrot.slane %v1145_v28, %v752_v13 }
 0x41e   :  { %1019 = vrcp.f32 %v611_v19  ;;  %v617_v21 = vrot.slane %v616_v20, 1 }
 0x420   :  { %v618_v22 = vadd.f32 %v617_v21, %v616_v20 }
 0x422   :  { %1021 = vrcp.f32 %v618_v22  ;;  %v765_v22 = vand.u32 127, %v46_v25 }
 0x42b   :  { %v1020_v23 = vpop.eup %1019 }
 0x42c   :  { %v620_v24 = vmul.f32 %v1020_v23, %v602_v4  ;;  %v766_v23 = vadd.s32 4294967295, %v765_v22 }
 0x42e   :  { %625 = vperm.xlu0 %1013, %v620_v24   ;;  %v769_v24 = vsub.s32 %v766_v23, %v1137_v26 }
 0x42f   :  { %v1022_v29 = vpop.eup %1021 }
 0x430   :  { %v622_v30 = vmul.f32 %v1022_v29, %v603_v9 }
 0x432   :  { %630 = vperm.xlu1 %1014, %v622_v30  }
 0x4a9   :  { %v626_v52 = vpop.permute.xlu0 %625 }
 0x4aa   :  { %v633_v53 = vmul.f32 %v626_v52, %v411_v51  ;;  %v770_v30 = vrot.slane %v626_v52, %v769_v24 }
 0x4ac   :  { %v635_v55 = vsel %vm50_vm0, %v633_v53, 0.0 }
 0x4ad   :  { %v636_v27 = vrot.slane %v635_v55, 4  ;;  %v631_v56 = vpop.permute.xlu1 %630 }
 0x4ae   :  { %v634_v57 = vmul.f32 %v631_v56, %v416_v54  ;;  %v774_v29 = vrot.slane %v631_v56, %v769_v24 }
 0x4af   :  { %v637_v58 = vadd.f32 %v636_v27, %v635_v55 }
 0x4b0   :  { %v642_v60 = vsel %vm50_vm0, %v634_v57, 0.0  ;;  %v775_v28 = vsel %vm447_vm1, %v774_v29, %v770_v30 }
 0x4b1   :  { %v638_v61 = vrot.slane %v637_v58, 2  ;;  %v643_v62 = vrot.slane %v642_v60, 4 }
 0x4b3   :  { %v639_v63 = vadd.f32 %v638_v61, %v637_v58  ;;  %v644_v0 = vadd.f32 %v643_v62, %v642_v60 }
 0x4b5   :  { %v645_v1 = vrot.slane %v644_v0, 2  ;;  %v640_v3 = vrot.slane %v639_v63, 1 }
 0x4b7   :  { %v646_v2 = vadd.f32 %v645_v1, %v644_v0  ;;  %v641_v5 = vadd.f32 %v640_v3, %v639_v63 }
 0x4b9   :  { %v647_v4 = vrot.slane %v646_v2, 1 }
 0x4bb   :  { %v648_v6 = vadd.f32 %v647_v4, %v646_v2 }
 0x4bd   :  { %v654_v7 = vsel %vm447_vm1, %v648_v6, %v641_v5 }
 0x4be   :  { %655 = vrot.lane.b32.xlu1 %v654_v7, %s1072_s2  ;;  %s1076_s2 = smov [#allocation5]  }
 0x4bf   :  { %s787_s23 = sshll.u32 %s1076_s2, 4  ;;  %s788_s23 = int_to_ptr.vmem [resolvable:$true] %s787_s23 }
 0x4c0   :  { %s1043_s24 = scalar_lea.vmem %s788_s23, 32  ;;  %p1048_p6 = scmp.lt.s32.totalorder %s788_s23, %s788_s23 }
 0x4c1   :  { %p1044_p5 = scmp.ne.s32.totalorder %s788_s23, %s1043_s24  ;;  %p1049_p7 = scmp.lt.s32.totalorder %s1043_s24, %s1043_s24 }
 0x4c3   :  { %p1050_p8 = por %p1049_p7, %p1048_p6 }
 0x4c5   :  { %p1051_p9 = pnand %p1050_p8, %p1044_p5 }
 0x530   :  { %v656_v8 = vpop.permute.xlu1 %655 }
 0x531   :  { %v658_v9 = vsel %vm50_vm0, %v1118_v11, %v656_v8 }
 0x532   :  { %1001 = vmatmul.mubr.f32.vlgmr.msra.gmra.mxu1 %v658_v9 }
 0x5f2   :  { %v745_v14 = vpop.f32.mrf.mxu1 }
 0x5f3   :  { %v746_v15 = vadd.f32 %v745_v14, %v678_v12 }
 0x5f4   :  { %v1002_v17 = vpop.f32.mrf.mxu1 }
 0x5f5   :  { %v749_v18 = vmax.f32 %v746_v15, 0.0 }
 0x5f7   :  { %v754_v19 = vmul.f32 %v753_v16, %v749_v18 }
 0x5f9   :  { %v756_v20 = vsel %vm755_vm6, %v754_v19, 0.0 }
 0x5fa   :  { %757 = vadd.xlane.f32.xlu1 %v756_v20 }
 0x683   :  { %v758_v21 = vpop.xlane.xlu1 %757 }
 0x684   :  { %v759_v11 = vadd.f32 %v758_v21, %v1199_v59 }
 0x686   :  { %761 = vrot.lane.b32.xlu0 %v759_v11, %s1075_s3 }
 0x6f8   :  { %v762_v31 = vpop.permute.xlu0 %761 }
 0x6f9   :  { %v777_v32 = vsel %vm604_vm4, %v762_v31, %v775_v28 }
 0x6fa   :  { %v779_v33 = vsel %vm778_vm7, %v777_v32, 0.0 }
 0x6fb   :  { %780 = vst [vmem:[#allocation5] sm:$0x3] %v779_v33 }
 0x6fc   :  { %1054 = shalt.err (!%p1051_p9)
}
 0x6fd   :  { %790 = dma.vmem_to_hbm [thread:$0]  %s788_s23, 32, %s1295_s5, [#allocation4]  }
 0x6fe   :  { %1065 = dma.done.wait [#allocation4], 32  }
 0x6ff   :  { %1066 = vsyncadd [#allocation4], 4294967264 }
 0x700   :  { %794 = vsyncpa [#allocation3], 1 }
 0x701   :  { %795 = vsyncpa [#allocation4], 1 }

</bundles_post_ra>
